<compile_context>
chip_gen: v7x
topology: tpu7x:2x2x1
jax: 0.10.0
libtpu: 0.0.40
codegen_flags: <defaults>
</compile_context>

<pallas_src>
import jax
import jax.numpy as jnp
from jax.experimental import pallas as pl
from jax.experimental.pallas import tpu as pltpu

INPUT_DIM = 100
K_PAD = 128           # input features zero-padded to a full 128-lane vreg
H1 = 256
H2 = 128


def _round_up(n, m):
    return ((n + m - 1) // m) * m


def _discriminator_kernel(x_ref, w1_ref, b1_ref, w2_ref, b2_ref,
                          w3_ref, b3_ref, o_ref):
    """Transposed forward pass.

    x_ref : (K_PAD, bm)  compute dtype (streamed per grid step)
    w1_ref: (H1, K_PAD)  compute dtype   w2_ref: (H2, H1) compute dtype
    b1_ref: (H1, 1) f32  b2_ref: (H2, 1) f32
    w3_ref: (H2, 1) f32  b3_ref: (1, 1) f32
    o_ref : (1, bm) f32  lane-dense sigmoid row
    """
    # layer 1: W1 @ x^T + b1, LeakyReLU(0.2)            -> (H1, bm)
    h = jnp.dot(w1_ref[...], x_ref[...], preferred_element_type=jnp.float32)
    h = h + b1_ref[...]
    h = jnp.maximum(h, 0.2 * h)

    # layer 2: W2 @ h1 + b2, LeakyReLU(0.2)             -> (H2, bm)
    h = jnp.dot(w2_ref[...], h.astype(w2_ref.dtype),
                preferred_element_type=jnp.float32)
    h = h + b2_ref[...]
    h = jnp.maximum(h, 0.2 * h)

    # layer 3: W3 @ h2 + b3 as VPU multiply + sublane reduction (off the MXU),
    # producing a lane-dense (1, bm) row.
    logit = jnp.sum(h * w3_ref[...], axis=0, keepdims=True) + b3_ref[...]

    # sigmoid (exp lands on the EUP slot)
    o_ref[...] = (1.0 / (1.0 + jnp.exp(-logit))).astype(o_ref.dtype)


def discriminator_forward(x, params, *, block_b=1024,
                          compute_dtype=jnp.float32):
    """x: (B, INPUT_DIM) float32 -> (B, 1) float32 probabilities."""
    w1, b1, w2, b2, w3, b3 = params
    B, K = x.shape
    assert K == INPUT_DIM

    # Batch tile (lane dim of the transposed layout): multiple of 128,
    # clamped so tiny batches do not allocate a huge tile.
    bm = max(128, _round_up(min(block_b, B), 128))
    grid = pl.cdiv(B, bm)          # ragged batches are padded, not rejected
    b_pad = grid * bm

    # --- one-time host-side prep (pad K 100->128, pad batch, cast, transpose
    #     so batch lives on lanes).  Fuses to a single XLA op under jit. ---
    x_t = jnp.pad(x, ((0, b_pad - B), (0, K_PAD - K))).astype(compute_dtype).T
    w1_p = jnp.pad(w1, ((0, 0), (0, K_PAD - K))).astype(compute_dtype)  # (H1,K_PAD)
    w2_c = w2.astype(compute_dtype)                                     # (H2,H1)
    b1_c = b1.reshape(H1, 1).astype(jnp.float32)
    b2_c = b2.reshape(H2, 1).astype(jnp.float32)
    w3_c = w3.reshape(H2, 1).astype(jnp.float32)
    b3_c = b3.reshape(1, 1).astype(jnp.float32)

    def resident(arr):
        # small weights/biases: constant index_map -> fetched once, VMEM-resident
        return pl.BlockSpec(arr.shape, lambda i: tuple(0 for _ in arr.shape))

    out = pl.pallas_call(
        _discriminator_kernel,
        out_shape=jax.ShapeDtypeStruct((1, b_pad), jnp.float32),
        grid_spec=pltpu.PrefetchScalarGridSpec(
            num_scalar_prefetch=0,
            grid=(grid,),
            in_specs=[
                pl.BlockSpec((K_PAD, bm), lambda i: (0, i)),   # streamed x tile
                resident(w1_p), resident(b1_c),
                resident(w2_c), resident(b2_c),
                resident(w3_c), resident(b3_c),
            ],
            out_specs=pl.BlockSpec((1, bm), lambda i: (0, i)),  # lane-dense row
        ),
        compiler_params=pltpu.CompilerParams(
            dimension_semantics=("parallel",)),
    )(x_t, w1_p, b1_c, w2_c, b2_c, w3_c, b3_c)

    return out[0, :B].reshape(B, 1)


def init_params(key):
    """PyTorch nn.Linear layout & default init:
    W: (fan_out, fan_in), b: (fan_out,), both U(-1/sqrt(fan_in), 1/sqrt(fan_in))."""
    ks = jax.random.split(key, 6)

    def linear(kw, kb, fan_in, fan_out):
        bound = 1.0 / jnp.sqrt(float(fan_in))
        w = jax.random.uniform(kw, (fan_out, fan_in), jnp.float32,
                               minval=-bound, maxval=bound)
        b = jax.random.uniform(kb, (fan_out,), jnp.float32,
                               minval=-bound, maxval=bound)
        return w, b

    w1, b1 = linear(ks[0], ks[1], INPUT_DIM, H1)
    w2, b2 = linear(ks[2], ks[3], H1, H2)
    w3, b3 = linear(ks[4], ks[5], H2, 1)
    return (w1, b1, w2, b2, w3, b3)


def reference_forward(x, params):
    w1, b1, w2, b2, w3, b3 = params
    h = x @ w1.T + b1
    h = jnp.where(h > 0, h, 0.2 * h)
    h = h @ w2.T + b2
    h = jnp.where(h > 0, h, 0.2 * h)
    h = h @ w3.T + b3
    return jax.nn.sigmoid(h)


if __name__ == "__main__":
    key = jax.random.PRNGKey(0)
    k_params, k_x1, k_x2 = jax.random.split(key, 3)
    params = init_params(k_params)

    # --- small batch, f32 operands ---
    x_small = jax.random.normal(k_x1, (8, INPUT_DIM), jnp.float32)
    out_small = jax.block_until_ready(
        discriminator_forward(x_small, params, compute_dtype=jnp.float32))
    ref_small = reference_forward(x_small, params)
    assert out_small.shape == (8, 1)
    err = float(jnp.max(jnp.abs(out_small - ref_small)))
    assert err < 5e-3, f"f32 mismatch: max abs err = {err}"

    # --- larger ragged batch: multi-step grid, padding path, bf16 operands ---
    x_big = jax.random.normal(k_x2, (300, INPUT_DIM), jnp.float32)
    out_big = jax.block_until_ready(
        discriminator_forward(x_big, params, block_b=128,
                              compute_dtype=jnp.bfloat16))
    ref_big = reference_forward(x_big, params)
    assert out_big.shape == (300, 1)
    err_big = float(jnp.max(jnp.abs(out_big - ref_big)))
    assert err_big < 3e-2, f"bf16 mismatch: max abs err = {err_big}"

    print("KERNEL_OK")
</pallas_src>

<mosaic_0001>
module attributes {stable_mosaic.version = 11 : i64} {
  func.func @_discriminator_kernel(%arg0: i32, %arg1: memref<128x128xf32, #tpu.memory_space<vmem>>, %arg2: memref<256x128xf32, #tpu.memory_space<vmem>>, %arg3: memref<256x1xf32, #tpu.memory_space<vmem>>, %arg4: memref<128x256xf32, #tpu.memory_space<vmem>>, %arg5: memref<128x1xf32, #tpu.memory_space<vmem>>, %arg6: memref<128x1xf32, #tpu.memory_space<vmem>>, %arg7: memref<1x1xf32, #tpu.memory_space<vmem>>, %arg8: memref<1x128xf32, #tpu.memory_space<vmem>>) attributes {dimension_semantics = [#tpu.dimension_semantics<parallel>], iteration_bounds = array<i64: 1>, scalar_prefetch = 0 : i64, scratch_operands = 0 : i64, tpu.core_type = #tpu.core_type<tc>, window_params = [{transform_indices = @transform_0, window_bounds = array<i64: 128, 128>}, {pipeline_mode = #tpu.pipeline_mode<synchronous>, transform_indices = @transform_1, window_bounds = array<i64: 256, 128>}, {pipeline_mode = #tpu.pipeline_mode<synchronous>, transform_indices = @transform_2, window_bounds = array<i64: 256, 1>}, {pipeline_mode = #tpu.pipeline_mode<synchronous>, transform_indices = @transform_3, window_bounds = array<i64: 128, 256>}, {pipeline_mode = #tpu.pipeline_mode<synchronous>, transform_indices = @transform_4, window_bounds = array<i64: 128, 1>}, {pipeline_mode = #tpu.pipeline_mode<synchronous>, transform_indices = @transform_5, window_bounds = array<i64: 128, 1>}, {pipeline_mode = #tpu.pipeline_mode<synchronous>, transform_indices = @transform_6, window_bounds = array<i64: 1, 1>}, {transform_indices = @transform_7, window_bounds = array<i64: 1, 128>}]} {
    %c0 = arith.constant 0 : index
    %c0_0 = arith.constant 0 : index
    %0 = vector.load %arg2[%c0, %c0_0] : memref<256x128xf32, #tpu.memory_space<vmem>>, vector<256x128xf32>
    %c0_1 = arith.constant 0 : index
    %c0_2 = arith.constant 0 : index
    %1 = vector.load %arg1[%c0_1, %c0_2] : memref<128x128xf32, #tpu.memory_space<vmem>>, vector<128x128xf32>
    %cst = arith.constant dense<0.000000e+00> : vector<256x128xf32>
    %2 = tpu.matmul %0, %1, %cst {dimension_numbers = #tpu.dot_dimension_numbers<[1], [0], [0], [1], [0, 0, 1, 1], [], []>} : vector<256x128xf32>, vector<128x128xf32>, vector<256x128xf32> -> vector<256x128xf32>
    %c0_3 = arith.constant 0 : index
    %c0_4 = arith.constant 0 : index
    %3 = vector.load %arg3[%c0_3, %c0_4] : memref<256x1xf32, #tpu.memory_space<vmem>>, vector<256x1xf32>
    %4 = vector.broadcast %3 : vector<256x1xf32> to vector<256x128xf32>
    %5 = arith.addf %2, %4 : vector<256x128xf32>
    %cst_5 = arith.constant 2.000000e-01 : f32
    %6 = vector.broadcast %cst_5 : f32 to vector<256x128xf32>
    %7 = arith.mulf %6, %5 : vector<256x128xf32>
    %8 = arith.maximumf %5, %7 : vector<256x128xf32>
    %c0_6 = arith.constant 0 : index
    %c0_7 = arith.constant 0 : index
    %9 = vector.load %arg4[%c0_6, %c0_7] : memref<128x256xf32, #tpu.memory_space<vmem>>, vector<128x256xf32>
    %cst_8 = arith.constant dense<0.000000e+00> : vector<128x128xf32>
    %10 = tpu.matmul %9, %8, %cst_8 {dimension_numbers = #tpu.dot_dimension_numbers<[1], [0], [0], [1], [0, 0, 1, 1], [], []>} : vector<128x256xf32>, vector<256x128xf32>, vector<128x128xf32> -> vector<128x128xf32>
    %c0_9 = arith.constant 0 : index
    %c0_10 = arith.constant 0 : index
    %11 = vector.load %arg5[%c0_9, %c0_10] : memref<128x1xf32, #tpu.memory_space<vmem>>, vector<128x1xf32>
    %12 = vector.broadcast %11 : vector<128x1xf32> to vector<128x128xf32>
    %13 = arith.addf %10, %12 : vector<128x128xf32>
    %cst_11 = arith.constant 2.000000e-01 : f32
    %14 = vector.broadcast %cst_11 : f32 to vector<128x128xf32>
    %15 = arith.mulf %14, %13 : vector<128x128xf32>
    %16 = arith.maximumf %13, %15 : vector<128x128xf32>
    %c0_12 = arith.constant 0 : index
    %c0_13 = arith.constant 0 : index
    %17 = vector.load %arg6[%c0_12, %c0_13] : memref<128x1xf32, #tpu.memory_space<vmem>>, vector<128x1xf32>
    %18 = vector.broadcast %17 : vector<128x1xf32> to vector<128x128xf32>
    %19 = arith.mulf %16, %18 : vector<128x128xf32>
    %cst_14 = arith.constant dense<0.000000e+00> : vector<128xf32>
    %20 = vector.multi_reduction <add>, %19, %cst_14 [0] : vector<128x128xf32> to vector<128xf32>
    %21 = vector.shape_cast %20 : vector<128xf32> to vector<1x128xf32>
    %c0_15 = arith.constant 0 : index
    %c0_16 = arith.constant 0 : index
    %22 = vector.load %arg7[%c0_15, %c0_16] : memref<1x1xf32, #tpu.memory_space<vmem>>, vector<1x1xf32>
    %23 = vector.broadcast %22 : vector<1x1xf32> to vector<1x128xf32>
    %24 = arith.addf %21, %23 : vector<1x128xf32>
    %cst_17 = arith.constant 0.000000e+00 : f32
    %25 = vector.broadcast %cst_17 : f32 to vector<1x128xf32>
    %26 = arith.subf %25, %24 : vector<1x128xf32>
    %27 = math.exp %26 : vector<1x128xf32>
    %cst_18 = arith.constant 1.000000e+00 : f32
    %28 = vector.broadcast %cst_18 : f32 to vector<1x128xf32>
    %29 = arith.addf %28, %27 : vector<1x128xf32>
    %cst_19 = arith.constant 1.000000e+00 : f32
    %30 = vector.broadcast %cst_19 : f32 to vector<1x128xf32>
    %31 = arith.divf %30, %29 : vector<1x128xf32>
    %c0_20 = arith.constant 0 : index
    %c0_21 = arith.constant 0 : index
    %32 = vector.load %arg8[%c0_20, %c0_21] : memref<1x128xf32, #tpu.memory_space<vmem>>, vector<1x128xf32>
    tpu.vector_store %arg8[%c0_20, %c0_21], %31 {strides = array<i32>} : memref<1x128xf32, #tpu.memory_space<vmem>>, vector<1x128xf32>,
    return
  }
  func.func @transform_0(%arg0: i32) -> (i32, i32) {
    %c0_i32 = arith.constant 0 : i32
    %c0_i32_0 = arith.constant 0 : i32
    return %c0_i32, %arg0 : i32, i32
  }
  func.func @transform_1(%arg0: i32) -> (i32, i32) {
    %c0_i32 = arith.constant 0 : i32
    %c0_i32_0 = arith.constant 0 : i32
    %c0_i32_1 = arith.constant 0 : i32
    return %c0_i32, %c0_i32_0 : i32, i32
  }
  func.func @transform_2(%arg0: i32) -> (i32, i32) {
    %c0_i32 = arith.constant 0 : i32
    %c0_i32_0 = arith.constant 0 : i32
    %c0_i32_1 = arith.constant 0 : i32
    return %c0_i32, %c0_i32_0 : i32, i32
  }
  func.func @transform_3(%arg0: i32) -> (i32, i32) {
    %c0_i32 = arith.constant 0 : i32
    %c0_i32_0 = arith.constant 0 : i32
    %c0_i32_1 = arith.constant 0 : i32
    return %c0_i32, %c0_i32_0 : i32, i32
  }
  func.func @transform_4(%arg0: i32) -> (i32, i32) {
    %c0_i32 = arith.constant 0 : i32
    %c0_i32_0 = arith.constant 0 : i32
    %c0_i32_1 = arith.constant 0 : i32
    return %c0_i32, %c0_i32_0 : i32, i32
  }
  func.func @transform_5(%arg0: i32) -> (i32, i32) {
    %c0_i32 = arith.constant 0 : i32
    %c0_i32_0 = arith.constant 0 : i32
    %c0_i32_1 = arith.constant 0 : i32
    return %c0_i32, %c0_i32_0 : i32, i32
  }
  func.func @transform_6(%arg0: i32) -> (i32, i32) {
    %c0_i32 = arith.constant 0 : i32
    %c0_i32_0 = arith.constant 0 : i32
    %c0_i32_1 = arith.constant 0 : i32
    return %c0_i32, %c0_i32_0 : i32, i32
  }
  func.func @transform_7(%arg0: i32) -> (i32, i32) {
    %c0_i32 = arith.constant 0 : i32
    %c0_i32_0 = arith.constant 0 : i32
    return %c0_i32, %arg0 : i32, i32
  }
}

</mosaic_0001>

<bundles_post_ra>
// kernel: tpu_custom_call.1
= control target key start
LH: loop header
LB: loop body
LE: loop exit
PB: predicated region body
PF: predicated region fallthrough
CT: control target
= control target key end

     0   :  { %s1902_s0 = inlined_call_operand.hbm [shape: f32[128,128], index: 0, kind: input, shape index: {}]   ;;  %s1903_s1 = inlined_call_operand.vmem [shape: f32[256,128], index: 1, kind: input, shape index: {}]   ;;  %s1904_s2 = inlined_call_operand.vmem [shape: f32[256,1], index: 2, kind: input, shape index: {}]   ;;  %s1905_s3 = inlined_call_operand.vmem [shape: f32[128,256], index: 3, kind: input, shape index: {}]   ;;  %s1906_s4 = inlined_call_operand.vmem [shape: f32[128,1], index: 4, kind: input, shape index: {}]   ;;  %s1907_s5 = inlined_call_operand.vmem [shape: f32[128,1], index: 5, kind: input, shape index: {}]   ;;  %s1908_s6 = inlined_call_operand.<no memory space> [shape: f32[1,1], index: 6, kind: input, shape index: {}]   ;;  %s1909_s7 = inlined_call_operand.hbm [shape: f32[1,128], index: 7, kind: output, shape index: {}]  }
   0x1   :  { %v12_v0 = vstv %s1908_s6 }
   0x2   :  { %13 = vst [vmem:[#allocation2] sm:$0x1] %v12_v0 }
   0x3   :  { %14 = vsyncpa [#allocation4], 0 }
   0x4   :  { %15 = vsyncpa [#allocation5], 0  ;;  %s1374_s26 = smov [#allocation3]   ;;  %s1326_s30 = scalar_lea.hbm %s1902_s0, 2048 }
   0x5   :  { %s21_s27 = sshll.u32 %s1374_s26, 4  ;;  %p1327_p0 = scmp.ne.s32.totalorder %s1902_s0, %s1326_s30  ;;  %s22_s27 = int_to_ptr.vmem [resolvable:$true] %s21_s27 }
   0x6   :  { %p1330_p1 = scmp.lt.u32.totalorder %s1326_s30, %s1902_s0 }
   0x8   :  { %p1332_p2 = pnand %p1330_p1, %p1327_p0 }
   0xa   :  { %1335 = shalt.err (!%p1332_p2)
}
   0xb   :  { %s1336_s6 = scalar_lea.vmem %s22_s27, 2048  ;;  %p1341_p4 = scmp.lt.s32.totalorder %s22_s27, %s22_s27 }
   0xc   :  { %p1337_p3 = scmp.ne.s32.totalorder %s22_s27, %s1336_s6  ;;  %p1342_p5 = scmp.lt.s32.totalorder %s1336_s6, %s1336_s6 }
   0xe   :  { %p1343_p6 = por %p1342_p5, %p1341_p4 }
  0x10   :  { %p1344_p7 = pnand %p1343_p6, %p1337_p3 }
  0x12   :  { %1347 = shalt.err (!%p1344_p7)
}
  0x13   :  { %s1375_s12 = smov 128   ;;  %s1376_s13 = smov 8  }
  0x14   :  { %27 = dma.hbm_to_vmem [thread:$0]  %s1902_s0, 2048, %s22_s27, [#allocation4], %s1375_s12, %s1375_s12, %s1376_s13  }
  0x15   :  { %1370 = dma.done.wait [#allocation4], 2048  }
  0x16   :  { %1371 = vsyncadd [#allocation4], 4294965248  ;;  %v1377_v1 = vmov 0   ;;  %v107_v2 = vld [vmem:[%s1904_s2 + $0x80] sm:$0xff]  ;;  %v76_v5 = vld [vmem:[#allocation3 + $0x8] sm:$0xff] }
  0x17   :  { %1321 = vset.pattern.permute.xlu1 %v1377_v1  ;;  %1320 = vset.pattern.permute.xlu0 %v1377_v1  ;;  %v91_v3 = vld [vmem:[%s1904_s2] sm:$0xff]  ;;  %v108_v7 = vld [vmem:[%s1904_s2 + $0x88] sm:$0xff]  ;;  %v77_v8 = vld [vmem:[#allocation3 + $0x10] sm:$0xff] }
  0x18   :  { %v75_v4 = vld [vmem:[#allocation3] sm:$0xff]  ;;  %205 = vperm.xlu0 %1320, %v107_v2   ;;  %125 = vperm.xlu1 %1321, %v91_v3   ;;  %v78_v9 = vld [vmem:[#allocation3 + $0x18] sm:$0xff]  ;;  %v80_v13 = vld [vmem:[#allocation3 + $0x28] sm:$0xff] }
  0x19   :  { %v1251_v6 = vpack.c.bf16 %v76_v5, %v75_v4  ;;  %v92_v10 = vld [vmem:[%s1904_s2 + $0x8] sm:$0xff]  ;;  %v1255_v11 = vpack.c.bf16 %v78_v9, %v77_v8  ;;  %v109_v14 = vld [vmem:[%s1904_s2 + $0x90] sm:$0xff]  ;;  %v110_v16 = vld [vmem:[%s1904_s2 + $0x98] sm:$0xff] }
  0x1a   :  { %v79_v12 = vld [vmem:[#allocation3 + $0x20] sm:$0xff]  ;;  %v81_v17 = vld [vmem:[#allocation3 + $0x30] sm:$0xff]  ;;  %v82_v18 = vld [vmem:[#allocation3 + $0x38] sm:$0xff] }
  0x1b   :  { %1252 = vmatprep.subr.bf16.mxu0 %v1251_v6  ;;  %v1259_v15 = vpack.c.bf16 %v80_v13, %v79_v12  ;;  %v93_v19 = vld [vmem:[%s1904_s2 + $0x10] sm:$0xff]  ;;  %v94_v20 = vld [vmem:[%s1904_s2 + $0x18] sm:$0xff]  ;;  %v1263_v21 = vpack.c.bf16 %v82_v18, %v81_v17  ;;  %v83_v22 = vld [vmem:[#allocation3 + $0x40] sm:$0xff] }
  0x1c   :  { %1254 = vmatpush3.bf16.msra.mxu0 %v1251_v6  ;;  %210 = vperm.xlu0 %1320, %v108_v7   ;;  %v84_v23 = vld [vmem:[#allocation3 + $0x48] sm:$0xff]  ;;  %v43_v24 = vld [vmem:[%s1903_s1] sm:$0xff]  ;;  %v85_v28 = vld [vmem:[#allocation3 + $0x50] sm:$0xff] }
  0x1d   :  { %130 = vperm.xlu1 %1321, %v92_v10   ;;  %1256 = vmatprep.subr.bf16.mxu0 %v1255_v11  ;;  %v111_v25 = vld [vmem:[%s1904_s2 + $0xa0] sm:$0xff]  ;;  %v1267_v26 = vpack.c.bf16 %v84_v23, %v83_v22  ;;  %v112_v27 = vld [vmem:[%s1904_s2 + $0xa8] sm:$0xff]  ;;  %v113_v35 = vld [vmem:[%s1904_s2 + $0xb0] sm:$0xff] }
  0x1e   :  { %1203 = vmatprep.mubr.f32.mxu0 %v43_v24  ;;  %v86_v29 = vld [vmem:[#allocation3 + $0x58] sm:$0xff]  ;;  %v96_v32 = vld [vmem:[%s1904_s2 + $0x28] sm:$0xff]  ;;  %v89_v38 = vld [vmem:[#allocation3 + $0x70] sm:$0xff] }
  0x1f   :  { %v95_v30 = vld [vmem:[%s1904_s2 + $0x20] sm:$0xff]  ;;  %v1271_v31 = vpack.c.bf16 %v86_v29, %v85_v28  ;;  %v88_v34 = vld [vmem:[#allocation3 + $0x68] sm:$0xff]  ;;  %v114_v37 = vld [vmem:[%s1904_s2 + $0xb8] sm:$0xff] }
  0x20   :  { %1258 = vmatpush3.bf16.msra.mxu0 %v1255_v11  ;;  %215 = vperm.xlu0 %1320, %v109_v14   ;;  %v87_v33 = vld [vmem:[#allocation3 + $0x60] sm:$0xff]  ;;  %v90_v39 = vld [vmem:[#allocation3 + $0x78] sm:$0xff]  ;;  %v97_v40 = vld [vmem:[%s1904_s2 + $0x30] sm:$0xff] }
  0x21   :  { %220 = vperm.xlu1 %1321, %v110_v16   ;;  %1260 = vmatprep.subr.bf16.mxu0 %v1259_v15  ;;  %v1275_v36 = vpack.c.bf16 %v88_v34, %v87_v33  ;;  %v1279_v41 = vpack.c.bf16 %v90_v39, %v89_v38  ;;  %v98_v42 = vld [vmem:[%s1904_s2 + $0x38] sm:$0xff]  ;;  %v115_v43 = vld [vmem:[%s1904_s2 + $0xc0] sm:$0xff]  ;;  %v116_v44 = vld [vmem:[%s1904_s2 + $0xc8] sm:$0xff] }
  0x22   :  { %v44_v45 = vld [vmem:[%s1903_s1 + $0x8] sm:$0xff]  ;;  %v99_v46 = vld [vmem:[%s1904_s2 + $0x40] sm:$0xff]  ;;  %v45_v47 = vld [vmem:[%s1903_s1 + $0x10] sm:$0xff] }
  0x23   :  { %v100_v48 = vld [vmem:[%s1904_s2 + $0x48] sm:$0xff]  ;;  %v46_v49 = vld [vmem:[%s1903_s1 + $0x18] sm:$0xff]  ;;  %v117_v50 = vld [vmem:[%s1904_s2 + $0xd0] sm:$0xff] }
  0x24   :  { %1262 = vmatpush3.bf16.msra.mxu0 %v1259_v15  ;;  %135 = vperm.xlu0 %1320, %v93_v19   ;;  %v47_v51 = vld [vmem:[%s1903_s1 + $0x20] sm:$0xff]  ;;  %v118_v52 = vld [vmem:[%s1904_s2 + $0xd8] sm:$0xff]  ;;  %v48_v53 = vld [vmem:[%s1903_s1 + $0x28] sm:$0xff] }
  0x25   :  { %140 = vperm.xlu1 %1321, %v94_v20   ;;  %1264 = vmatprep.subr.bf16.mxu0 %v1263_v21  ;;  %v101_v54 = vld [vmem:[%s1904_s2 + $0x50] sm:$0xff]  ;;  %v102_v56 = vld [vmem:[%s1904_s2 + $0x58] sm:$0xff]  ;;  %v119_v58 = vld [vmem:[%s1904_s2 + $0xe0] sm:$0xff] }
  0x26   :  { %v49_v55 = vld [vmem:[%s1903_s1 + $0x30] sm:$0xff]  ;;  %v50_v57 = vld [vmem:[%s1903_s1 + $0x38] sm:$0xff]  ;;  %v51_v59 = vld [vmem:[%s1903_s1 + $0x40] sm:$0xff] }
  0x27   :  { %v120_v60 = vld [vmem:[%s1904_s2 + $0xe8] sm:$0xff]  ;;  %v103_v62 = vld [vmem:[%s1904_s2 + $0x60] sm:$0xff]  ;;  %v53_v63 = vld [vmem:[%s1903_s1 + $0x50] sm:$0xff] }
  0x28   :  { %1266 = vmatpush3.bf16.msra.mxu0 %v1263_v21  ;;  %225 = vperm.xlu0 %1320, %v111_v25   ;;  %v52_v61 = vld [vmem:[%s1903_s1 + $0x48] sm:$0xff]  ;;  %v54_v1 = vld [vmem:[%s1903_s1 + $0x58] sm:$0xff]  ;;  %v121_v2 = vld [vmem:[%s1904_s2 + $0xf0] sm:$0xff] }
  0x29   :  { %230 = vperm.xlu1 %1321, %v112_v27   ;;  %1268 = vmatprep.subr.bf16.mxu0 %v1267_v26  ;;  %v104_v0 = vld [vmem:[%s1904_s2 + $0x68] sm:$0xff]  ;;  %v55_v3 = vld [vmem:[%s1903_s1 + $0x60] sm:$0xff]  ;;  %v122_v4 = vld [vmem:[%s1904_s2 + $0xf8] sm:$0xff] }
  0x2a   :  { %v56_v5 = vld [vmem:[%s1903_s1 + $0x68] sm:$0xff]  ;;  %v105_v6 = vld [vmem:[%s1904_s2 + $0x70] sm:$0xff]  ;;  %v106_v8 = vld [vmem:[%s1904_s2 + $0x78] sm:$0xff] }
  0x2b   :  { %v57_v7 = vld [vmem:[%s1903_s1 + $0x70] sm:$0xff]  ;;  %v58_v9 = vld [vmem:[%s1903_s1 + $0x78] sm:$0xff]  ;;  %v604_v10 = vld [vmem:[%s1906_s4] sm:$0xff] }
  0x2c   :  { %1270 = vmatpush3.bf16.msra.mxu0 %v1267_v26  ;;  %145 = vperm.xlu0 %1320, %v95_v30   ;;  %v59_v11 = vld [vmem:[%s1903_s1 + $0x80] sm:$0xff]  ;;  %v605_v12 = vld [vmem:[%s1906_s4 + $0x8] sm:$0xff]  ;;  %v606_v14 = vld [vmem:[%s1906_s4 + $0x10] sm:$0xff] }
  0x2d   :  { %150 = vperm.xlu1 %1321, %v96_v32   ;;  %1272 = vmatprep.subr.bf16.mxu0 %v1271_v31  ;;  %v60_v13 = vld [vmem:[%s1903_s1 + $0x88] sm:$0xff]  ;;  %v61_v15 = vld [vmem:[%s1903_s1 + $0x90] sm:$0xff]  ;;  %v607_v16 = vld [vmem:[%s1906_s4 + $0x18] sm:$0xff] }
  0x2e   :  { %v62_v17 = vld [vmem:[%s1903_s1 + $0x98] sm:$0xff]  ;;  %v608_v18 = vld [vmem:[%s1906_s4 + $0x20] sm:$0xff]  ;;  %v64_v21 = vld [vmem:[%s1903_s1 + $0xa8] sm:$0xff] }
  0x2f   :  { %v63_v19 = vld [vmem:[%s1903_s1 + $0xa0] sm:$0xff]  ;;  %v878_v22 = vld [vmem:[%s1907_s5 + $0x8] sm:$0xff]  ;;  %v65_v23 = vld [vmem:[%s1903_s1 + $0xb0] sm:$0xff] }
  0x30   :  { %1274 = vmatpush3.bf16.msra.mxu0 %v1271_v31  ;;  %235 = vperm.xlu0 %1320, %v113_v35   ;;  %v877_v20 = vld [vmem:[%s1907_s5] sm:$0xff]  ;;  %v609_v24 = vld [vmem:[%s1906_s4 + $0x28] sm:$0xff]  ;;  %v66_v25 = vld [vmem:[%s1903_s1 + $0xb8] sm:$0xff] }
  0x31   :  { %240 = vperm.xlu1 %1321, %v114_v37   ;;  %1276 = vmatprep.subr.bf16.mxu0 %v1275_v36  ;;  %v879_v26 = vld [vmem:[%s1907_s5 + $0x10] sm:$0xff]  ;;  %v67_v27 = vld [vmem:[%s1903_s1 + $0xc0] sm:$0xff]  ;;  %v68_v29 = vld [vmem:[%s1903_s1 + $0xc8] sm:$0xff] }
  0x32   :  { %v610_v28 = vld [vmem:[%s1906_s4 + $0x30] sm:$0xff]  ;;  %v880_v30 = vld [vmem:[%s1907_s5 + $0x18] sm:$0xff]  ;;  %v881_v34 = vld [vmem:[%s1907_s5 + $0x20] sm:$0xff] }
  0x33   :  { %v69_v31 = vld [vmem:[%s1903_s1 + $0xd0] sm:$0xff]  ;;  %v611_v32 = vld [vmem:[%s1906_s4 + $0x38] sm:$0xff]  ;;  %v71_v35 = vld [vmem:[%s1903_s1 + $0xe0] sm:$0xff] }
  0x34   :  { %1278 = vmatpush3.bf16.msra.mxu0 %v1275_v36  ;;  %155 = vperm.xlu0 %1320, %v97_v40   ;;  %v70_v33 = vld [vmem:[%s1903_s1 + $0xd8] sm:$0xff]  ;;  %v612_v36 = vld [vmem:[%s1906_s4 + $0x40] sm:$0xff]  ;;  %v72_v37 = vld [vmem:[%s1903_s1 + $0xe8] sm:$0xff] }
  0x35   :  { %160 = vperm.xlu1 %1321, %v98_v42   ;;  %1280 = vmatprep.subr.bf16.mxu0 %v1279_v41  ;;  %v882_v38 = vld [vmem:[%s1907_s5 + $0x28] sm:$0xff]  ;;  %v73_v39 = vld [vmem:[%s1903_s1 + $0xf0] sm:$0xff] }
  0x36   :  { %v613_v40 = vld [vmem:[%s1906_s4 + $0x48] sm:$0xff]  ;;  %v883_v42 = vld [vmem:[%s1907_s5 + $0x30] sm:$0xff] }
  0x38   :  { %1282 = vmatpush3.bf16.msra.mxu0 %v1279_v41  ;;  %245 = vperm.xlu0 %1320, %v115_v43   ;;  %v74_v41 = vld [vmem:[%s1903_s1 + $0xf8] sm:$0xff]  ;;  %v614_v43 = vld [vmem:[%s1906_s4 + $0x50] sm:$0xff] }
  0x39   :  { %250 = vperm.xlu1 %1321, %v116_v44   ;;  %v884_v44 = vld [vmem:[%s1907_s5 + $0x38] sm:$0xff] }
  0x3b   :  { %1204 = vmatmul.mubr.f32.vlgmr.msra.gmra.mrb[0].mxu0 %v44_v45  ;;  %v615_v45 = vld [vmem:[%s1906_s4 + $0x58] sm:$0xff] }
  0x3c   :  { %165 = vperm.xlu0 %1320, %v99_v46   ;;  %1206 = vmatprep.mubr.f32.mxu0 %v45_v47  ;;  %v885_v46 = vld [vmem:[%s1907_s5 + $0x40] sm:$0xff] }
  0x3d   :  { %170 = vperm.xlu1 %1321, %v100_v48   ;;  %v616_v47 = vld [vmem:[%s1906_s4 + $0x60] sm:$0xff]  ;;  %v886_v48 = vld [vmem:[%s1907_s5 + $0x48] sm:$0xff] }
  0x3f   :  { %1207 = vmatmul.mubr.f32.gmra.mrb[2].mxu0 %v46_v49  ;;  %v617_v49 = vld [vmem:[%s1906_s4 + $0x68] sm:$0xff] }
  0x40   :  { %255 = vperm.xlu0 %1320, %v117_v50   ;;  %1209 = vmatprep.mubr.f32.mxu0 %v47_v51  ;;  %v887_v50 = vld [vmem:[%s1907_s5 + $0x50] sm:$0xff] }
  0x41   :  { %260 = vperm.xlu1 %1321, %v118_v52   ;;  %v618_v51 = vld [vmem:[%s1906_s4 + $0x70] sm:$0xff]  ;;  %v888_v52 = vld [vmem:[%s1907_s5 + $0x58] sm:$0xff] }
  0x43   :  { %1210 = vmatmul.mubr.f32.gmra.mrb[4].mxu0 %v48_v53  ;;  %v619_v53 = vld [vmem:[%s1906_s4 + $0x78] sm:$0xff] }
  0x44   :  { %175 = vperm.xlu0 %1320, %v101_v54   ;;  %1212 = vmatprep.mubr.f32.mxu0 %v49_v55  ;;  %v889_v54 = vld [vmem:[%s1907_s5 + $0x60] sm:$0xff]  ;;  %v890_v55 = vld [vmem:[%s1907_s5 + $0x68] sm:$0xff] }
  0x45   :  { %180 = vperm.xlu1 %1321, %v102_v56   ;;  %v891_v56 = vld [vmem:[%s1907_s5 + $0x70] sm:$0xff] }
  0x47   :  { %1213 = vmatmul.mubr.f32.gmra.mrb[6].mxu0 %v50_v57  ;;  %v892_v57 = vld [vmem:[%s1907_s5 + $0x78] sm:$0xff] }
  0x48   :  { %265 = vperm.xlu0 %1320, %v119_v58   ;;  %1215 = vmatprep.mubr.f32.mxu0 %v51_v59  ;;  %v1010_v58 = vld [vmem:[#allocation2] sm:$0x1] }
  0x49   :  { %270 = vperm.xlu1 %1321, %v120_v60  }
  0x4b   :  { %1216 = vmatmul.mubr.f32.gmra.mrb[8].mxu0 %v52_v61  ;;  %v573_v61 = vld [vmem:[%s1905_s3 + $0x8] sm:$0xff] }
  0x4c   :  { %185 = vperm.xlu0 %1320, %v103_v62   ;;  %1218 = vmatprep.mubr.f32.mxu0 %v53_v63 }
  0x4d   :  { %190 = vperm.xlu1 %1321, %v104_v0   ;;  %764 = vmatprep.mubr.f32.mxu1 %v573_v61 }
  0x4f   :  { %1219 = vmatmul.mubr.f32.gmra.mrb[10].mxu0 %v54_v1 }
  0x50   :  { %275 = vperm.xlu0 %1320, %v121_v2   ;;  %1221 = vmatprep.mubr.f32.mxu0 %v55_v3 }
  0x51   :  { %280 = vperm.xlu1 %1321, %v122_v4  }
  0x53   :  { %1222 = vmatmul.mubr.f32.gmra.mrb[12].mxu0 %v56_v5 }
  0x54   :  { %195 = vperm.xlu0 %1320, %v105_v6   ;;  %1224 = vmatprep.mubr.f32.mxu0 %v57_v7 }
  0x55   :  { %200 = vperm.xlu1 %1321, %v106_v8  }
  0x57   :  { %1225 = vmatmul.mubr.f32.gmra.mrb[14].mxu0 %v58_v9 }
  0x58   :  { %622 = vperm.xlu0 %1320, %v604_v10   ;;  %1227 = vmatprep.mubr.f32.mxu0 %v59_v11 }
  0x59   :  { %627 = vperm.xlu1 %1321, %v605_v12  }
  0x5b   :  { %1228 = vmatmul.mubr.f32.gmra.mrb[16].mxu0 %v60_v13 }
  0x5c   :  { %632 = vperm.xlu0 %1320, %v606_v14   ;;  %1230 = vmatprep.mubr.f32.mxu0 %v61_v15 }
  0x5d   :  { %637 = vperm.xlu1 %1321, %v607_v16  }
  0x5f   :  { %1231 = vmatmul.mubr.f32.gmra.mrb[18].mxu0 %v62_v17 }
  0x60   :  { %642 = vperm.xlu0 %1320, %v608_v18   ;;  %1233 = vmatprep.mubr.f32.mxu0 %v63_v19 }
  0x61   :  { %895 = vperm.xlu1 %1321, %v877_v20  }
  0x63   :  { %1234 = vmatmul.mubr.f32.gmra.mrb[20].mxu0 %v64_v21 }
  0x64   :  { %900 = vperm.xlu0 %1320, %v878_v22   ;;  %1236 = vmatprep.mubr.f32.mxu0 %v65_v23 }
  0x65   :  { %647 = vperm.xlu1 %1321, %v609_v24  }
  0x67   :  { %1237 = vmatmul.mubr.f32.gmra.mrb[22].mxu0 %v66_v25 }
  0x68   :  { %905 = vperm.xlu0 %1320, %v879_v26   ;;  %1239 = vmatprep.mubr.f32.mxu0 %v67_v27 }
  0x69   :  { %652 = vperm.xlu1 %1321, %v610_v28  }
  0x6b   :  { %1240 = vmatmul.mubr.f32.gmra.mrb[24].mxu0 %v68_v29 }
  0x6c   :  { %910 = vperm.xlu0 %1320, %v880_v30   ;;  %1242 = vmatprep.mubr.f32.mxu0 %v69_v31 }
  0x6d   :  { %657 = vperm.xlu1 %1321, %v611_v32  }
  0x6f   :  { %1243 = vmatmul.mubr.f32.gmra.mrb[26].mxu0 %v70_v33 }
  0x70   :  { %915 = vperm.xlu0 %1320, %v881_v34   ;;  %1245 = vmatprep.mubr.f32.mxu0 %v71_v35 }
  0x71   :  { %662 = vperm.xlu1 %1321, %v612_v36  }
  0x73   :  { %1246 = vmatmul.mubr.f32.gmra.mrb[28].mxu0 %v72_v37 }
  0x74   :  { %920 = vperm.xlu0 %1320, %v882_v38   ;;  %1248 = vmatprep.mubr.f32.mxu0 %v73_v39 }
  0x75   :  { %667 = vperm.xlu1 %1321, %v613_v40  }
  0x77   :  { %1249 = vmatmul.mubr.f32.gmra.mrb[30].mxu0 %v74_v41 }
  0x78   :  { %925 = vperm.xlu0 %1320, %v883_v42  }
  0x79   :  { %672 = vperm.xlu1 %1321, %v614_v43  }
  0x7c   :  { %930 = vperm.xlu0 %1320, %v884_v44  }
  0x7d   :  { %677 = vperm.xlu1 %1321, %v615_v45  }
  0x80   :  { %935 = vperm.xlu0 %1320, %v885_v46  }
  0x81   :  { %682 = vperm.xlu1 %1321, %v616_v47  }
  0x84   :  { %940 = vperm.xlu0 %1320, %v886_v48  }
  0x85   :  { %687 = vperm.xlu1 %1321, %v617_v49  }
  0x88   :  { %945 = vperm.xlu0 %1320, %v887_v50  }
  0x89   :  { %692 = vperm.xlu1 %1321, %v618_v51  }
  0x8c   :  { %950 = vperm.xlu0 %1320, %v888_v52  }
  0x8d   :  { %697 = vperm.xlu1 %1321, %v619_v53  }
  0x90   :  { %955 = vperm.xlu0 %1320, %v889_v54  }
  0x91   :  { %960 = vperm.xlu1 %1321, %v890_v55  }
  0x94   :  { %965 = vperm.xlu0 %1320, %v891_v56  }
  0x95   :  { %970 = vperm.xlu1 %1321, %v892_v57  }
  0x97   :  { %v126_v59 = vpop.permute.xlu1 %125  ;;  %v1722_v60 = vpop.permute.xlu0 %205 }
  0x98   :  { %1013 = vperm.xlu0 %1320, %v1010_v58  }
  0x9b   :  { %v1727_v63 = vpop.permute.xlu0 %210 }
  0x9c   :  { %v131_v62 = vpop.permute.xlu1 %130 }
  0x9f   :  { %v1731_v1 = vpop.permute.xlu0 %215 }
  0xa0   :  { %v1729_v0 = vpop.permute.xlu1 %220 }
  0xa3   :  { %v136_v3 = vpop.permute.xlu0 %135 }
  0xa4   :  { %v141_v2 = vpop.permute.xlu1 %140 }
  0xa7   :  { %v1735_v5 = vpop.permute.xlu0 %225 }
  0xa8   :  { %v1733_v4 = vpop.permute.xlu1 %230 }
  0xab   :  { %v146_v7 = vpop.permute.xlu0 %145 }
  0xac   :  { %v151_v6 = vpop.permute.xlu1 %150 }
  0xaf   :  { %v1739_v9 = vpop.permute.xlu0 %235 }
  0xb0   :  { %v1737_v8 = vpop.permute.xlu1 %240 }
  0xb3   :  { %v156_v11 = vpop.permute.xlu0 %155 }
  0xb4   :  { %v161_v10 = vpop.permute.xlu1 %160 }
  0xb7   :  { %v1743_v13 = vpop.permute.xlu0 %245 }
  0xb8   :  { %v1741_v12 = vpop.permute.xlu1 %250 }
  0xbb   :  { %v166_v15 = vpop.permute.xlu0 %165 }
  0xbc   :  { %v171_v14 = vpop.permute.xlu1 %170 }
  0xbf   :  { %v1747_v17 = vpop.permute.xlu0 %255 }
  0xc0   :  { %v1745_v16 = vpop.permute.xlu1 %260 }
  0xc3   :  { %v176_v26 = vpop.permute.xlu0 %175 }
  0xc4   :  { %v181_v23 = vpop.permute.xlu1 %180 }
  0xc7   :  { %v1753_v42 = vpop.permute.xlu0 %265 }
  0xc8   :  { %v1751_v39 = vpop.permute.xlu1 %270 }
  0xcb   :  { %v186_v57 = vpop.permute.xlu0 %185 }
  0xcc   :  { %v191_v53 = vpop.permute.xlu1 %190 }
 0x10e   :  { %v1205_v18 = vpop.f32.mrb[0].mxu0 }
 0x10f   :  { %v355_v19 = vadd.f32 %v1205_v18, %v131_v62  ;;  %v349_v20 = vpop.f32.mrb[1].mxu0 }
 0x110   :  { %v350_v21 = vadd.f32 %v349_v20, %v126_v59  ;;  %v1761_v20 = vpop.permute.xlu1 %280 }
 0x111   :  { %v509_v22 = vmul.f32 0.2, %v355_v19 }
 0x112   :  { %v508_v24 = vmul.f32 0.2, %v350_v21  ;;  %v1208_v25 = vpop.f32.mrb[2].mxu0 }
 0x113   :  { %v541_v27 = vmax.f32 %v355_v19, %v509_v22  ;;  %v365_v28 = vadd.f32 %v1208_v25, %v141_v2  ;;  %v359_v29 = vpop.f32.mrb[3].mxu0 }
 0x114   :  { %v540_v30 = vmax.f32 %v350_v21, %v508_v24  ;;  %v360_v31 = vadd.f32 %v359_v29, %v136_v3  ;;  %v1763_v24 = vpop.permute.xlu0 %275 }
 0x115   :  { %v511_v32 = vmul.f32 0.2, %v365_v28 }
 0x116   :  { %v510_v33 = vmul.f32 0.2, %v360_v31  ;;  %v1211_v34 = vpop.f32.mrb[4].mxu0  ;;  %v1749_v35 = vpack.c.bf16 %v541_v27, %v540_v30 }
 0x117   :  { %v543_v36 = vmax.f32 %v365_v28, %v511_v32  ;;  %v375_v37 = vadd.f32 %v1211_v34, %v151_v6  ;;  %v369_v38 = vpop.f32.mrb[5].mxu0  ;;  %v201_v34 = vpop.permute.xlu1 %200 }
 0x118   :  { %v542_v40 = vmax.f32 %v360_v31, %v510_v33  ;;  %v370_v41 = vadd.f32 %v369_v38, %v146_v7  ;;  %v196_v38 = vpop.permute.xlu0 %195 }
 0x119   :  { %v513_v43 = vmul.f32 0.2, %v375_v37 }
 0x11a   :  { %v512_v44 = vmul.f32 0.2, %v370_v41  ;;  %v1214_v45 = vpop.f32.mrb[6].mxu0  ;;  %v1755_v46 = vpack.c.bf16 %v543_v36, %v542_v40 }
 0x11b   :  { %v545_v47 = vmax.f32 %v375_v37, %v513_v43  ;;  %v385_v48 = vadd.f32 %v1214_v45, %v161_v10  ;;  %v379_v49 = vpop.f32.mrb[7].mxu0 }
 0x11c   :  { %v544_v50 = vmax.f32 %v370_v41, %v512_v44  ;;  %v380_v51 = vadd.f32 %v379_v49, %v156_v11 }
 0x11d   :  { %v515_v52 = vmul.f32 0.2, %v385_v48 }
 0x11e   :  { %v514_v54 = vmul.f32 0.2, %v380_v51  ;;  %v1217_v55 = vpop.f32.mrb[8].mxu0  ;;  %v1757_v56 = vpack.c.bf16 %v545_v47, %v544_v50 }
 0x11f   :  { %v547_v58 = vmax.f32 %v385_v48, %v515_v52  ;;  %v395_v59 = vadd.f32 %v1217_v55, %v171_v14  ;;  %v389_v61 = vpop.f32.mrb[9].mxu0 }
 0x120   :  { %v546_v62 = vmax.f32 %v380_v51, %v514_v54  ;;  %v390_v2 = vadd.f32 %v389_v61, %v166_v15 }
 0x121   :  { %v517_v3 = vmul.f32 0.2, %v395_v59 }
 0x122   :  { %v516_v6 = vmul.f32 0.2, %v390_v2  ;;  %v1220_v7 = vpop.f32.mrb[10].mxu0  ;;  %v1759_v18 = vpack.c.bf16 %v547_v58, %v546_v62 }
 0x123   :  { %v549_v10 = vmax.f32 %v395_v59, %v517_v3  ;;  %v405_v19 = vadd.f32 %v1220_v7, %v181_v23  ;;  %v399_v11 = vpop.f32.mrb[11].mxu0 }
 0x124   :  { %v548_v21 = vmax.f32 %v390_v2, %v516_v6  ;;  %v400_v22 = vadd.f32 %v399_v11, %v176_v26 }
 0x125   :  { %v519_v25 = vmul.f32 0.2, %v405_v19 }
 0x126   :  { %v518_v27 = vmul.f32 0.2, %v400_v22  ;;  %v1223_v14 = vpop.f32.mrb[12].mxu0  ;;  %v1765_v28 = vpack.c.bf16 %v549_v10, %v548_v21 }
 0x127   :  { %v551_v15 = vmax.f32 %v405_v19, %v519_v25  ;;  %v415_v29 = vadd.f32 %v1223_v14, %v191_v53  ;;  %v409_v30 = vpop.f32.mrb[13].mxu0 }
 0x128   :  { %v550_v31 = vmax.f32 %v400_v22, %v518_v27  ;;  %v410_v32 = vadd.f32 %v409_v30, %v186_v57 }
 0x129   :  { %v521_v33 = vmul.f32 0.2, %v415_v29 }
 0x12a   :  { %v520_v23 = vmul.f32 0.2, %v410_v32  ;;  %v1226_v36 = vpop.f32.mrb[14].mxu0  ;;  %v1767_v37 = vpack.c.bf16 %v551_v15, %v550_v31 }
 0x12b   :  { %v553_v26 = vmax.f32 %v415_v29, %v521_v33  ;;  %v425_v40 = vadd.f32 %v1226_v36, %v201_v34  ;;  %v419_v41 = vpop.f32.mrb[15].mxu0 }
 0x12c   :  { %v552_v43 = vmax.f32 %v410_v32, %v520_v23  ;;  %v420_v44 = vadd.f32 %v419_v41, %v196_v38 }
 0x12d   :  { %v523_v45 = vmul.f32 0.2, %v425_v40 }
 0x12e   :  { %v522_v47 = vmul.f32 0.2, %v420_v44  ;;  %v1229_v48 = vpop.f32.mrb[16].mxu0  ;;  %v1769_v49 = vpack.c.bf16 %v553_v26, %v552_v43 }
 0x12f   :  { %v555_v50 = vmax.f32 %v425_v40, %v523_v45  ;;  %v435_v51 = vadd.f32 %v1229_v48, %v1727_v63  ;;  %v429_v52 = vpop.f32.mrb[17].mxu0 }
 0x130   :  { %v554_v53 = vmax.f32 %v420_v44, %v522_v47  ;;  %v430_v54 = vadd.f32 %v429_v52, %v1722_v60 }
 0x131   :  { %v525_v55 = vmul.f32 0.2, %v435_v51 }
 0x132   :  { %v524_v57 = vmul.f32 0.2, %v430_v54  ;;  %v1232_v58 = vpop.f32.mrb[18].mxu0  ;;  %v1773_v59 = vpack.c.bf16 %v555_v50, %v554_v53 }
 0x133   :  { %v445_v61 = vadd.f32 %v1232_v58, %v1729_v0  ;;  %v439_v62 = vpop.f32.mrb[19].mxu0  ;;  %v557_v2 = vmax.f32 %v435_v51, %v525_v55 }
 0x134   :  { %v440_v3 = vadd.f32 %v439_v62, %v1731_v1  ;;  %v556_v6 = vmax.f32 %v430_v54, %v524_v57 }
 0x135   :  { %v527_v7 = vmul.f32 0.2, %v445_v61 }
 0x136   :  { %v526_v10 = vmul.f32 0.2, %v440_v3  ;;  %v1235_v19 = vpop.f32.mrb[20].mxu0  ;;  %v1283_v63 = vpack.c.bf16 %v557_v2, %v556_v6 }
 0x137   :  { %v559_v11 = vmax.f32 %v445_v61, %v527_v7  ;;  %v455_v21 = vadd.f32 %v1235_v19, %v1733_v4  ;;  %v449_v60 = vpop.f32.mrb[21].mxu0  ;;  %v578_v19 = vld [vmem:[%s1905_s3 + $0x30] sm:$0xff] }
 0x138   :  { %v558_v22 = vmax.f32 %v440_v3, %v526_v10  ;;  %v450_v25 = vadd.f32 %v449_v60, %v1735_v5  ;;  %1284 = vmatprep.subr.bf16.mxu1 %v1283_v63  ;;  %v579_v10 = vld [vmem:[%s1905_s3 + $0x38] sm:$0xff]  ;;  %v581_v63 = vld [vmem:[%s1905_s3 + $0x48] sm:$0xff]  ;;  %v582_v60 = vld [vmem:[%s1905_s3 + $0x50] sm:$0xff] }
 0x139   :  { %v529_v27 = vmul.f32 0.2, %v455_v21  ;;  %1286 = vmatpush3.bf16.msra.mxu1 %v1749_v35 }
 0x13a   :  { %v528_v0 = vmul.f32 0.2, %v450_v25  ;;  %v1238_v14 = vpop.f32.mrb[22].mxu0  ;;  %v1287_v15 = vpack.c.bf16 %v559_v11, %v558_v22  ;;  %v580_v11 = vld [vmem:[%s1905_s3 + $0x40] sm:$0xff]  ;;  %v585_v22 = vld [vmem:[%s1905_s3 + $0x68] sm:$0xff] }
 0x13b   :  { %v561_v1 = vmax.f32 %v455_v21, %v529_v27  ;;  %v465_v29 = vadd.f32 %v1238_v14, %v1737_v8  ;;  %v459_v30 = vpop.f32.mrb[23].mxu0  ;;  %v583_v21 = vld [vmem:[%s1905_s3 + $0x58] sm:$0xff]  ;;  %v589_v14 = vld [vmem:[%s1905_s3 + $0x88] sm:$0xff] }
 0x13c   :  { %v560_v31 = vmax.f32 %v450_v25, %v528_v0  ;;  %v460_v32 = vadd.f32 %v459_v30, %v1739_v9  ;;  %1288 = vmatprep.subr.bf16.mxu1 %v1287_v15  ;;  %v584_v25 = vld [vmem:[%s1905_s3 + $0x60] sm:$0xff]  ;;  %v587_v27 = vld [vmem:[%s1905_s3 + $0x78] sm:$0xff]  ;;  %v586_v0 = vld [vmem:[%s1905_s3 + $0x70] sm:$0xff] }
 0x13d   :  { %v531_v4 = vmul.f32 0.2, %v465_v29  ;;  %1290 = vmatpush3.bf16.msra.mxu1 %v1755_v46  ;;  %v588_v15 = vld [vmem:[%s1905_s3 + $0x80] sm:$0xff]  ;;  %v593_v30 = vld [vmem:[%s1905_s3 + $0xa8] sm:$0xff] }
 0x13e   :  { %v530_v33 = vmul.f32 0.2, %v460_v32  ;;  %v1241_v5 = vpop.f32.mrb[24].mxu0  ;;  %v1291_v34 = vpack.c.bf16 %v561_v1, %v560_v31  ;;  %v591_v1 = vld [vmem:[%s1905_s3 + $0x98] sm:$0xff]  ;;  %v592_v31 = vld [vmem:[%s1905_s3 + $0xa0] sm:$0xff] }
 0x13f   :  { %v563_v23 = vmax.f32 %v465_v29, %v531_v4  ;;  %v475_v35 = vadd.f32 %v1241_v5, %v1741_v12  ;;  %v469_v36 = vpop.f32.mrb[25].mxu0  ;;  %v590_v29 = vld [vmem:[%s1905_s3 + $0x90] sm:$0xff]  ;;  %v596_v5 = vld [vmem:[%s1905_s3 + $0xc0] sm:$0xff] }
 0x140   :  { %v562_v38 = vmax.f32 %v460_v32, %v530_v33  ;;  %v470_v26 = vadd.f32 %v469_v36, %v1743_v13  ;;  %1292 = vmatprep.subr.bf16.mxu1 %v1291_v34  ;;  %v595_v32 = vld [vmem:[%s1905_s3 + $0xb8] sm:$0xff]  ;;  %v594_v4 = vld [vmem:[%s1905_s3 + $0xb0] sm:$0xff]  ;;  %v597_v33 = vld [vmem:[%s1905_s3 + $0xc8] sm:$0xff] }
 0x141   :  { %v533_v8 = vmul.f32 0.2, %v475_v35  ;;  %1294 = vmatpush3.bf16.msra.mxu1 %v1757_v56  ;;  %v599_v34 = vld [vmem:[%s1905_s3 + $0xd8] sm:$0xff]  ;;  %v600_v36 = vld [vmem:[%s1905_s3 + $0xe0] sm:$0xff] }
 0x142   :  { %v532_v40 = vmul.f32 0.2, %v470_v26  ;;  %v1244_v9 = vpop.f32.mrb[26].mxu0  ;;  %v1295_v41 = vpack.c.bf16 %v563_v23, %v562_v38  ;;  %v598_v23 = vld [vmem:[%s1905_s3 + $0xd0] sm:$0xff]  ;;  %v603_v38 = vld [vmem:[%s1905_s3 + $0xf8] sm:$0xff] }
 0x143   :  { %v565_v43 = vmax.f32 %v475_v35, %v533_v8  ;;  %v485_v46 = vadd.f32 %v1244_v9, %v1745_v16  ;;  %v479_v44 = vpop.f32.mrb[27].mxu0  ;;  %v601_v35 = vld [vmem:[%s1905_s3 + $0xe8] sm:$0xff]  ;;  %v623_v8 = vpop.permute.xlu0 %622 }
 0x144   :  { %v564_v45 = vmax.f32 %v470_v26, %v532_v40  ;;  %v480_v47 = vadd.f32 %v479_v44, %v1747_v17  ;;  %1296 = vmatprep.subr.bf16.mxu1 %v1295_v41  ;;  %v602_v26 = vld [vmem:[%s1905_s3 + $0xf0] sm:$0xff]  ;;  %v628_v40 = vpop.permute.xlu1 %627 }
 0x145   :  { %v535_v12 = vmul.f32 0.2, %v485_v46  ;;  %1298 = vmatpush3.bf16.msra.mxu1 %v1759_v18 }
 0x146   :  { %v534_v48 = vmul.f32 0.2, %v480_v47  ;;  %v1247_v13 = vpop.f32.mrb[28].mxu0  ;;  %v1299_v50 = vpack.c.bf16 %v565_v43, %v564_v45 }
 0x147   :  { %v567_v51 = vmax.f32 %v485_v46, %v535_v12  ;;  %v495_v56 = vadd.f32 %v1247_v13, %v1751_v39  ;;  %v489_v52 = vpop.f32.mrb[29].mxu0  ;;  %v633_v9 = vpop.permute.xlu0 %632 }
 0x148   :  { %v566_v53 = vmax.f32 %v480_v47, %v534_v48  ;;  %v490_v54 = vadd.f32 %v489_v52, %v1753_v42  ;;  %1300 = vmatprep.subr.bf16.mxu1 %v1299_v50  ;;  %v638_v41 = vpop.permute.xlu1 %637 }
 0x149   :  { %v537_v16 = vmul.f32 0.2, %v495_v56  ;;  %1302 = vmatpush3.bf16.msra.mxu1 %v1765_v28 }
 0x14a   :  { %v536_v55 = vmul.f32 0.2, %v490_v54  ;;  %v1250_v17 = vpop.f32.mrb[30].mxu0  ;;  %v1303_v57 = vpack.c.bf16 %v567_v51, %v566_v53 }
 0x14b   :  { %v569_v58 = vmax.f32 %v495_v56, %v537_v16  ;;  %v505_v18 = vadd.f32 %v1250_v17, %v1761_v20  ;;  %v499_v61 = vpop.f32.mrb[31].mxu0  ;;  %v572_v20 = vld [vmem:[%s1905_s3] sm:$0xff]  ;;  %v643_v43 = vpop.permute.xlu0 %642 }
 0x14c   :  { %v568_v62 = vmax.f32 %v490_v54, %v536_v55  ;;  %v500_v2 = vadd.f32 %v499_v61, %v1763_v24  ;;  %1304 = vmatprep.subr.bf16.mxu1 %v1303_v57  ;;  %v575_v24 = vld [vmem:[%s1905_s3 + $0x18] sm:$0xff]  ;;  %v896_v46 = vpop.permute.xlu1 %895 }
 0x14d   :  { %v539_v39 = vmul.f32 0.2, %v505_v18  ;;  %1306 = vmatpush3.bf16.msra.mxu1 %v1767_v37  ;;  %v574_v37 = vld [vmem:[%s1905_s3 + $0x10] sm:$0xff] }
 0x14e   :  { %v538_v3 = vmul.f32 0.2, %v500_v2  ;;  %v1307_v42 = vpack.c.bf16 %v569_v58, %v568_v62 }
 0x14f   :  { %v571_v6 = vmax.f32 %v505_v18, %v539_v39  ;;  %v901_v44 = vpop.permute.xlu0 %900 }
 0x150   :  { %v570_v7 = vmax.f32 %v500_v2, %v538_v3  ;;  %1308 = vmatprep.subr.bf16.mxu1 %v1307_v42  ;;  %v648_v45 = vpop.permute.xlu1 %647 }
 0x151   :  { %1310 = vmatpush3.bf16.msra.mxu1 %v1769_v49  ;;  %v577_v49 = vld [vmem:[%s1905_s3 + $0x28] sm:$0xff] }
 0x152   :  { %v1311_v28 = vpack.c.bf16 %v571_v6, %v570_v7 }
 0x153   :  { %v906_v47 = vpop.permute.xlu0 %905 }
 0x154   :  { %1312 = vmatprep.subr.bf16.mxu1 %v1311_v28  ;;  %v653_v48 = vpop.permute.xlu1 %652 }
 0x155   :  { %1314 = vmatpush3.bf16.msra.mxu1 %v1773_v59  ;;  %v576_v59 = vld [vmem:[%s1905_s3 + $0x20] sm:$0xff]  ;;  %s1378_s3 = smov [#allocation6]  }
 0x156   :  { %s1034_s30 = sshll.u32 %s1378_s3, 4  ;;  %s1035_s30 = int_to_ptr.vmem [resolvable:$true] %s1034_s30 }
 0x157   :  { %v911_v51 = vpop.permute.xlu0 %910  ;;  %s1348_s8 = scalar_lea.vmem %s1035_s30, 16  ;;  %s1352_s9 = scalar_lea.vmem %s1035_s30, 32 }
 0x158   :  { %765 = vmatmul.mubr.f32.vlgmr.msra.gmra.mrb[0].mxu1 %v572_v20  ;;  %v658_v55 = vpop.permute.xlu1 %657  ;;  %p1349_p8 = scmp.ne.s32.totalorder %s1035_s30, %s1348_s8  ;;  %p1353_p9 = scmp.lt.s32.totalorder %s1035_s30, %s1035_s30 }
 0x159   :  { %769 = vmatprep.mubr.f32.mxu1 %v575_v24  ;;  %p1354_p10 = scmp.lt.s32.totalorder %s1352_s9, %s1348_s8 }
 0x15b   :  { %v916_v58 = vpop.permute.xlu0 %915  ;;  %p1355_p11 = por %p1354_p10, %p1353_p9 }
 0x15c   :  { %770 = vmatmul.mubr.f32.gmra.mrb[2].mxu1 %v574_v37  ;;  %v663_v6 = vpop.permute.xlu1 %662 }
 0x15d   :  { %774 = vmatprep.mubr.f32.mxu1 %v577_v49  ;;  %p1356_p12 = pnand %p1355_p11, %p1349_p8 }
 0x15f   :  { %v921_v49 = vpop.permute.xlu0 %920 }
 0x160   :  { %775 = vmatmul.mubr.f32.gmra.mrb[4].mxu1 %v576_v59 }
 0x161   :  { %779 = vmatprep.mubr.f32.mxu1 %v579_v10 }
 0x164   :  { %780 = vmatmul.mubr.f32.gmra.mrb[6].mxu1 %v578_v19 }
 0x165   :  { %784 = vmatprep.mubr.f32.mxu1 %v581_v63 }
 0x168   :  { %785 = vmatmul.mubr.f32.gmra.mrb[8].mxu1 %v580_v11 }
 0x169   :  { %789 = vmatprep.mubr.f32.mxu1 %v583_v21 }
 0x16c   :  { %790 = vmatmul.mubr.f32.gmra.mrb[10].mxu1 %v582_v60 }
 0x16d   :  { %794 = vmatprep.mubr.f32.mxu1 %v585_v22 }
 0x170   :  { %795 = vmatmul.mubr.f32.gmra.mrb[12].mxu1 %v584_v25  ;;  %v668_v25 = vpop.permute.xlu1 %667 }
 0x171   :  { %799 = vmatprep.mubr.f32.mxu1 %v587_v27 }
 0x174   :  { %800 = vmatmul.mubr.f32.gmra.mrb[14].mxu1 %v586_v0 }
 0x175   :  { %804 = vmatprep.mubr.f32.mxu1 %v589_v14 }
 0x178   :  { %805 = vmatmul.mubr.f32.gmra.mrb[16].mxu1 %v588_v15 }
 0x179   :  { %809 = vmatprep.mubr.f32.mxu1 %v591_v1  ;;  %v926_v1 = vpop.permute.xlu0 %925 }
 0x17c   :  { %810 = vmatmul.mubr.f32.gmra.mrb[18].mxu1 %v590_v29 }
 0x17d   :  { %814 = vmatprep.mubr.f32.mxu1 %v593_v30 }
 0x180   :  { %815 = vmatmul.mubr.f32.gmra.mrb[20].mxu1 %v592_v31 }
 0x181   :  { %819 = vmatprep.mubr.f32.mxu1 %v595_v32 }
 0x184   :  { %820 = vmatmul.mubr.f32.gmra.mrb[22].mxu1 %v594_v4 }
 0x185   :  { %824 = vmatprep.mubr.f32.mxu1 %v597_v33 }
 0x188   :  { %825 = vmatmul.mubr.f32.gmra.mrb[24].mxu1 %v596_v5 }
 0x189   :  { %829 = vmatprep.mubr.f32.mxu1 %v599_v34 }
 0x18c   :  { %830 = vmatmul.mubr.f32.gmra.mrb[26].mxu1 %v598_v23  ;;  %v673_v23 = vpop.permute.xlu1 %672 }
 0x18d   :  { %834 = vmatprep.mubr.f32.mxu1 %v601_v35 }
 0x190   :  { %835 = vmatmul.mubr.f32.gmra.mrb[28].mxu1 %v600_v36 }
 0x191   :  { %839 = vmatprep.mubr.f32.mxu1 %v603_v38 }
 0x194   :  { %840 = vmatmul.mubr.f32.gmra.mrb[30].mxu1 %v602_v26 }
 0x22b   :  { %v1123_v12 = vpop.f32.mrb[0].mxu1 }
 0x22c   :  { %v1124_v13 = vpop.f32.mrb[1].mxu1 }
 0x22d   :  { %v1125_v50 = vadd.f32 %v1124_v13, %v1123_v12  ;;  %v678_v13 = vpop.permute.xlu1 %677 }
 0x22f   :  { %v767_v56 = vadd.f32 %v1125_v50, %v623_v8  ;;  %v1126_v52 = vpop.f32.mrb[2].mxu1  ;;  %v931_v8 = vpop.permute.xlu0 %930 }
 0x230   :  { %v1127_v53 = vpop.f32.mrb[3].mxu1 }
 0x231   :  { %v845_v54 = vmul.f32 0.2, %v767_v56  ;;  %v1128_v16 = vadd.f32 %v1127_v53, %v1126_v52 }
 0x233   :  { %v772_v17 = vadd.f32 %v1128_v16, %v628_v40  ;;  %v1129_v57 = vpop.f32.mrb[4].mxu1  ;;  %v861_v61 = vmax.f32 %v767_v56, %v845_v54  ;;  %v936_v52 = vpop.permute.xlu0 %935 }
 0x234   :  { %v1130_v18 = vpop.f32.mrb[5].mxu1 }
 0x235   :  { %v846_v62 = vmul.f32 0.2, %v772_v17  ;;  %v1131_v2 = vadd.f32 %v1130_v18, %v1129_v57  ;;  %v973_v28 = vmul.f32 %v896_v46, %v861_v61 }
 0x237   :  { %v862_v39 = vmax.f32 %v772_v17, %v846_v62  ;;  %v777_v3 = vadd.f32 %v1131_v2, %v633_v9  ;;  %v1132_v42 = vpop.f32.mrb[6].mxu1 }
 0x238   :  { %v1133_v7 = vpop.f32.mrb[7].mxu1 }
 0x239   :  { %v974_v20 = vmul.f32 %v901_v44, %v862_v39  ;;  %v847_v24 = vmul.f32 0.2, %v777_v3  ;;  %v1134_v37 = vadd.f32 %v1133_v7, %v1132_v42  ;;  %v941_v42 = vpop.permute.xlu0 %940 }
 0x23b   :  { %v989_v59 = vadd.f32 %v974_v20, %v973_v28  ;;  %v863_v10 = vmax.f32 %v777_v3, %v847_v24  ;;  %v782_v19 = vadd.f32 %v1134_v37, %v638_v41  ;;  %v1135_v63 = vpop.f32.mrb[8].mxu1 }
 0x23c   :  { %v1136_v11 = vpop.f32.mrb[9].mxu1 }
 0x23d   :  { %v975_v21 = vmul.f32 %v906_v47, %v863_v10  ;;  %v848_v60 = vmul.f32 0.2, %v782_v19  ;;  %v1137_v22 = vadd.f32 %v1136_v11, %v1135_v63 }
 0x23f   :  { %v990_v27 = vadd.f32 %v989_v59, %v975_v21  ;;  %v864_v0 = vmax.f32 %v782_v19, %v848_v60  ;;  %v787_v14 = vadd.f32 %v1137_v22, %v643_v43  ;;  %v1138_v15 = vpop.f32.mrb[10].mxu1  ;;  %v946_v21 = vpop.permute.xlu0 %945 }
 0x240   :  { %v1139_v29 = vpop.f32.mrb[11].mxu1 }
 0x241   :  { %v976_v30 = vmul.f32 %v911_v51, %v864_v0  ;;  %v849_v31 = vmul.f32 0.2, %v787_v14  ;;  %v1140_v32 = vadd.f32 %v1139_v29, %v1138_v15 }
 0x243   :  { %v991_v4 = vadd.f32 %v990_v27, %v976_v30  ;;  %v865_v33 = vmax.f32 %v787_v14, %v849_v31  ;;  %v792_v5 = vadd.f32 %v1140_v32, %v648_v45  ;;  %v1141_v34 = vpop.f32.mrb[12].mxu1 }
 0x244   :  { %v1142_v35 = vpop.f32.mrb[13].mxu1 }
 0x245   :  { %v977_v36 = vmul.f32 %v916_v58, %v865_v33  ;;  %v850_v38 = vmul.f32 0.2, %v792_v5  ;;  %v1143_v26 = vadd.f32 %v1142_v35, %v1141_v34  ;;  %v951_v33 = vpop.permute.xlu0 %950 }
 0x247   :  { %v992_v40 = vadd.f32 %v991_v4, %v977_v36  ;;  %v866_v9 = vmax.f32 %v792_v5, %v850_v38  ;;  %v797_v41 = vadd.f32 %v1143_v26, %v653_v48  ;;  %v1144_v43 = vpop.f32.mrb[14].mxu1  ;;  %v683_v48 = vpop.permute.xlu1 %682 }
 0x248   :  { %v1145_v46 = vpop.f32.mrb[15].mxu1 }
 0x249   :  { %v978_v44 = vmul.f32 %v921_v49, %v866_v9  ;;  %v851_v47 = vmul.f32 0.2, %v797_v41  ;;  %v1146_v12 = vadd.f32 %v1145_v46, %v1144_v43 }
 0x24b   :  { %v993_v50 = vadd.f32 %v992_v40, %v978_v44  ;;  %v867_v51 = vmax.f32 %v797_v41, %v851_v47  ;;  %v802_v56 = vadd.f32 %v1146_v12, %v658_v55  ;;  %v1147_v45 = vpop.f32.mrb[16].mxu1  ;;  %v688_v10 = vpop.permute.xlu1 %687 }
 0x24c   :  { %v1148_v53 = vpop.f32.mrb[17].mxu1  ;;  %v956_v44 = vpop.permute.xlu0 %955 }
 0x24d   :  { %v979_v54 = vmul.f32 %v926_v1, %v867_v51  ;;  %v852_v16 = vmul.f32 0.2, %v802_v56  ;;  %v1149_v17 = vadd.f32 %v1148_v53, %v1147_v45 }
 0x24f   :  { %v994_v57 = vadd.f32 %v993_v50, %v979_v54  ;;  %v868_v58 = vmax.f32 %v802_v56, %v852_v16  ;;  %v807_v18 = vadd.f32 %v1149_v17, %v663_v6  ;;  %v1150_v61 = vpop.f32.mrb[18].mxu1 }
 0x250   :  { %v1151_v62 = vpop.f32.mrb[19].mxu1 }
 0x251   :  { %v980_v2 = vmul.f32 %v931_v8, %v868_v58  ;;  %v853_v39 = vmul.f32 0.2, %v807_v18  ;;  %v1152_v3 = vadd.f32 %v1151_v62, %v1150_v61 }
 0x253   :  { %v995_v7 = vadd.f32 %v994_v57, %v980_v2  ;;  %v869_v28 = vmax.f32 %v807_v18, %v853_v39  ;;  %v812_v20 = vadd.f32 %v1152_v3, %v668_v25  ;;  %v1153_v55 = vpop.f32.mrb[20].mxu1  ;;  %v693_v25 = vpop.permute.xlu1 %692 }
 0x254   :  { %v1154_v24 = vpop.f32.mrb[21].mxu1 }
 0x255   :  { %v981_v37 = vmul.f32 %v936_v52, %v869_v28  ;;  %v854_v49 = vmul.f32 0.2, %v812_v20  ;;  %v1155_v59 = vadd.f32 %v1154_v24, %v1153_v55  ;;  %v1016_v28 = vlaneseq }
 0x257   :  { %v996_v19 = vadd.f32 %v995_v7, %v981_v37  ;;  %v870_v63 = vmax.f32 %v812_v20, %v854_v49  ;;  %v817_v11 = vadd.f32 %v1155_v59, %v673_v23  ;;  %v1156_v6 = vpop.f32.mrb[22].mxu1  ;;  %v698_v40 = vpop.permute.xlu1 %697  ;;  %v1017_v24 = vshrl.u32 %v1016_v28, 7 }
 0x258   :  { %v1157_v60 = vpop.f32.mrb[23].mxu1 }
 0x259   :  { %v982_v22 = vmul.f32 %v941_v42, %v870_v63  ;;  %v855_v27 = vmul.f32 0.2, %v817_v11  ;;  %v1158_v0 = vadd.f32 %v1157_v60, %v1156_v6  ;;  %v1018_v59 = vsub.s32 0, %v1017_v24 }
 0x25b   :  { %v997_v14 = vadd.f32 %v996_v19, %v982_v22  ;;  %v871_v15 = vmax.f32 %v817_v11, %v855_v27  ;;  %v822_v1 = vadd.f32 %v1158_v0, %v678_v13  ;;  %v1159_v29 = vpop.f32.mrb[24].mxu1  ;;  %v961_v53 = vpop.permute.xlu1 %960 }
 0x25c   :  { %v1160_v30 = vpop.f32.mrb[25].mxu1 }
 0x25d   :  { %v983_v31 = vmul.f32 %v946_v21, %v871_v15  ;;  %v856_v32 = vmul.f32 0.2, %v822_v1  ;;  %v1161_v4 = vadd.f32 %v1160_v30, %v1159_v29 }
 0x25f   :  { %v998_v5 = vadd.f32 %v997_v14, %v983_v31  ;;  %v872_v34 = vmax.f32 %v822_v1, %v856_v32  ;;  %v827_v35 = vadd.f32 %v1161_v4, %v683_v48  ;;  %v1162_v23 = vpop.f32.mrb[26].mxu1  ;;  %v966_v48 = vpop.permute.xlu0 %965 }
 0x260   :  { %v1163_v36 = vpop.f32.mrb[27].mxu1  ;;  %v971_v42 = vpop.permute.xlu1 %970 }
 0x261   :  { %v984_v38 = vmul.f32 %v951_v33, %v872_v34  ;;  %v857_v26 = vmul.f32 0.2, %v827_v35  ;;  %v1164_v8 = vadd.f32 %v1163_v36, %v1162_v23 }
 0x263   :  { %v999_v9 = vadd.f32 %v998_v5, %v984_v38  ;;  %v873_v41 = vmax.f32 %v827_v35, %v857_v26  ;;  %v832_v43 = vadd.f32 %v1164_v8, %v688_v10  ;;  %v1165_v46 = vpop.f32.mrb[28].mxu1  ;;  %v1014_v19 = vpop.permute.xlu0 %1013 }
 0x264   :  { %v1166_v47 = vpop.f32.mrb[29].mxu1  ;;  %v1019_v11 = vrot.slane %v1014_v19, %v1018_v59 }
 0x265   :  { %v985_v12 = vmul.f32 %v956_v44, %v873_v41  ;;  %v858_v13 = vmul.f32 0.2, %v832_v43  ;;  %v1167_v50 = vadd.f32 %v1166_v47, %v1165_v46 }
 0x267   :  { %v1000_v51 = vadd.f32 %v999_v9, %v985_v12  ;;  %v874_v56 = vmax.f32 %v832_v43, %v858_v13  ;;  %v837_v45 = vadd.f32 %v1167_v50, %v693_v25  ;;  %v1168_v52 = vpop.f32.mrb[30].mxu1 }
 0x268   :  { %v1169_v54 = vpop.f32.mrb[31].mxu1 }
 0x269   :  { %v986_v16 = vmul.f32 %v961_v53, %v874_v56  ;;  %v859_v17 = vmul.f32 0.2, %v837_v45  ;;  %v1170_v57 = vadd.f32 %v1169_v54, %v1168_v52 }
 0x26b   :  { %v1001_v58 = vadd.f32 %v1000_v51, %v986_v16  ;;  %v875_v18 = vmax.f32 %v837_v45, %v859_v17  ;;  %v842_v61 = vadd.f32 %v1170_v57, %v698_v40 }
 0x26d   :  { %v987_v62 = vmul.f32 %v966_v48, %v875_v18  ;;  %v860_v2 = vmul.f32 0.2, %v842_v61 }
 0x26f   :  { %v1002_v39 = vadd.f32 %v1001_v58, %v987_v62  ;;  %v876_v3 = vmax.f32 %v842_v61, %v860_v2 }
 0x271   :  { %v988_v7 = vmul.f32 %v971_v42, %v876_v3 }
 0x273   :  { %v1003_v20 = vadd.f32 %v1002_v39, %v988_v7 }
 0x275   :  { %v1004_v55 = vrot.slane %v1003_v20, 4 }
 0x277   :  { %v1005_v37 = vadd.f32 %v1004_v55, %v1003_v20 }
 0x279   :  { %v1006_v49 = vrot.slane %v1005_v37, 2 }
 0x27b   :  { %v1007_v10 = vadd.f32 %v1006_v49, %v1005_v37 }
 0x27d   :  { %v1008_v63 = vrot.slane %v1007_v10, 1 }
 0x27f   :  { %v1009_v6 = vadd.f32 %v1008_v63, %v1007_v10 }
 0x281   :  { %v1020_v21 = vadd.f32 %v1019_v11, %v1009_v6 }
 0x283   :  { %v1021_v60 = vsub.f32 0.0, %v1020_v21 }
 0x285   :  { %v1022_v22 = vmul.f32 1.442695, %v1021_v60 }
 0x287   :  { %1322 = vpow2.f32 %v1022_v22 }
 0x291   :  { %v1323_v27 = vpop.eup %1322 }
 0x292   :  { %v1024_v0 = vadd.f32 1.0, %v1323_v27 }
 0x294   :  { %1324 = vrcp.f32 %v1024_v0 }
 0x29e   :  { %v1325_v14 = vpop.eup %1324 }
 0x29f   :  { %1027 = vst [vmem:[#allocation6] sm:$0x1] %v1325_v14 }
 0x2a0   :  { %1359 = shalt.err (!%p1356_p12)
}
 0x2a1   :  { %s1360_s6 = scalar_lea.hbm %s1909_s7, 16 }
 0x2a2   :  { %p1361_p13 = scmp.ne.s32.totalorder %s1909_s7, %s1360_s6  ;;  %p1364_p0 = scmp.lt.u32.totalorder %s1360_s6, %s1909_s7 }
 0x2a4   :  { %p1366_p1 = pnand %p1364_p0, %p1361_p13 }
 0x2a6   :  { %1369 = shalt.err (!%p1366_p1)
}
 0x2a7   :  { %1037 = dma.vmem_to_hbm [thread:$0]  %s1035_s30, 16, %s1909_s7, [#allocation5]  }
 0x2a8   :  { %1372 = dma.done.wait [#allocation5], 16  }
 0x2a9   :  { %1373 = vsyncadd [#allocation5], 4294967280 }
 0x2aa   :  { %1041 = vsyncpa [#allocation4], 1 }
 0x2ab   :  { %1042 = vsyncpa [#allocation5], 1 }

</bundles_post_ra>
